<compile_context>
chip_gen: v6e
topology: v6e:2x2x1
jax: 0.10.0
libtpu: 0.0.40
codegen_flags: <defaults>
</compile_context>

<pallas_src>
import functools

import jax
import jax.numpy as jnp
import numpy as np
from jax.experimental import pallas as pl
from jax.experimental.pallas import tpu as pltpu


def _round_up(x, m):
    return ((x + m - 1) // m) * m


def mlp_kernel(x_ref, w1_ref, w2_ref, w3_ref, b_ref, o_ref, *, h1p, h2p):
    """y = sigmoid(sigmoid(x@W1+b1)@W2+b2)@W3+b3 on one (TB, Fp) batch tile."""
    x = x_ref[...]                                   # (TB, Fp) bf16
    b1 = b_ref[:, 0:h1p]                             # lane-aligned static slices
    b2 = b_ref[:, h1p:h1p + h2p]
    b3 = b_ref[:, h1p + h2p:]

    def sigmoid(h):
        # tanh form: 1 EUP push per element (vs exp + reciprocal = 2).
        return 0.5 * jnp.tanh(0.5 * h) + 0.5

    h1 = jnp.dot(x, w1_ref[...], preferred_element_type=jnp.float32) + b1
    h1 = sigmoid(h1)                                 # f32 (safe on v5e VPU/EUP)
    h2 = jnp.dot(h1.astype(w2_ref.dtype), w2_ref[...],
                 preferred_element_type=jnp.float32) + b2
    h2 = sigmoid(h2)
    out = jnp.dot(h2.astype(w3_ref.dtype), w3_ref[...],
                  preferred_element_type=jnp.float32) + b3
    o_ref[...] = out.astype(o_ref.dtype)             # lane-dense (TB, Op) store


def prepare_params(params):
    """One-time prep: cast weights to bf16, zero-pad to lane multiples of 128,
    fuse the three biases into one lane-aligned row. Call once, reuse forever."""
    F, H1 = params["w1"].shape
    H2 = params["w2"].shape[1]
    O = params["w3"].shape[1]
    Fp, H1p, H2p, Op = (_round_up(d, 128) for d in (F, H1, H2, O))

    w1 = jnp.pad(params["w1"].astype(jnp.bfloat16), ((0, Fp - F), (0, H1p - H1)))
    w2 = jnp.pad(params["w2"].astype(jnp.bfloat16), ((0, H1p - H1), (0, H2p - H2)))
    w3 = jnp.pad(params["w3"].astype(jnp.bfloat16), ((0, H2p - H2), (0, Op - O)))
    b_all = jnp.concatenate([
        jnp.pad(params["b1"], (0, H1p - H1)),
        jnp.pad(params["b2"], (0, H2p - H2)),
        jnp.pad(params["b3"], (0, Op - O)),
    ]).astype(jnp.float32).reshape(1, H1p + H2p + Op)
    return {"w1": w1, "w2": w2, "w3": w3, "b": b_all}


def nn_forward(x, prepared, *, n_output, block_b=512):
    """Pallas forward. x: (B, F) f32; prepared = prepare_params(params)."""
    B, F = x.shape
    w1, w2, w3, b_all = prepared["w1"], prepared["w2"], prepared["w3"], prepared["b"]
    Fp, H1p = w1.shape
    H2p = w2.shape[1]
    Op = w3.shape[1]

    # ---- VMEM budget & batch tile --------------------------------------------
    # Resident weights are single-buffered; x/out tiles are double-buffered by
    # the auto pipeline. Keep total comfortably under v7x's 64 MiB physical.
    budget = 40 << 20
    resident = (w1.size + w2.size + w3.size) * 2 + b_all.size * 4
    per_row = (2 * Fp * 2                # 2x streamed x tile (bf16)
               + 2 * Op * 4              # 2x output tile (f32)
               + (H1p + H2p + Op) * 4    # f32 intermediates
               + (H1p + H2p) * 2)        # bf16 casts of h1/h2
    # TODO(synk): add a K/N-tiled fallback (hidden-dim grid axes + f32 acc
    # scratch) if resident weight bytes ever approach the VMEM budget.
    tb_cap = min(block_b, max(16, ((budget - resident) // per_row) // 16 * 16))

    if B > tb_cap:
        TB = tb_cap
    elif B > 16:
        # >= 2 grid steps so v7x's two TensorCores both get a share of the batch.
        TB = min(tb_cap, _round_up(pl.cdiv(B, 2), 16))
    else:
        TB = _round_up(max(B, 1), 16)    # bf16 sublane packing is (16, 128)
    Bp = _round_up(B, TB)

    # Streamed activations: zero-pad batch rows + feature lanes, bf16 for the MXU.
    # Under jit the pad + cast fuse with x's producer; zero padding keeps results exact.
    xp = jnp.pad(x, ((0, Bp - B), (0, Fp - F))).astype(jnp.bfloat16)

    vmem_limit = int(min(64 << 20,
                         max(2 * (resident + TB * per_row) + (2 << 20), 16 << 20)))

    kernel = functools.partial(mlp_kernel, h1p=H1p, h2p=H2p)

    flops = 2 * Bp * (Fp * H1p + H1p * H2p + H2p * Op)
    transcendentals = Bp * (H1p + H2p)                 # one tanh per hidden element
    bytes_accessed = (xp.size * 2
                      + (w1.size + w2.size + w3.size) * 2
                      + b_all.size * 4 + Bp * Op * 4)

    def resident_spec(shape):
        # Constant index_map -> stays in VMEM across grid steps; single buffer.
        return pl.BlockSpec(shape, lambda i: (0, 0), pipeline_mode=pl.Buffered(1))

    out = pl.pallas_call(
        kernel,
        out_shape=jax.ShapeDtypeStruct((Bp, Op), jnp.float32),
        grid=(Bp // TB,),
        in_specs=[
            pl.BlockSpec((TB, Fp), lambda i: (i, 0)),       # streamed activations
            resident_spec((Fp, H1p)),                       # resident W1
            resident_spec((H1p, H2p)),                      # resident W2
            resident_spec((H2p, Op)),                       # resident W3
            resident_spec((1, H1p + H2p + Op)),             # fused biases
        ],
        out_specs=pl.BlockSpec((TB, Op), lambda i: (i, 0)),
        compiler_params=pltpu.CompilerParams(
            dimension_semantics=("parallel",),
            vmem_limit_bytes=vmem_limit),
        cost_estimate=pl.CostEstimate(
            flops=flops, transcendentals=transcendentals,
            bytes_accessed=bytes_accessed),
    )(xp, w1, w2, w3, b_all)

    return out[:B, :n_output]


def init_params(key, n_feature, n_hidden1, n_hidden2, n_output):
    """torch.nn.Linear default init: U(-1/sqrt(fan_in), +1/sqrt(fan_in))."""
    ks = jax.random.split(key, 6)

    def linear(kw, kb, fan_in, fan_out):
        bound = 1.0 / np.sqrt(fan_in)
        # stored transposed (fan_in, fan_out) so the kernel computes x @ W
        w = jax.random.uniform(kw, (fan_in, fan_out), jnp.float32, -bound, bound)
        b = jax.random.uniform(kb, (fan_out,), jnp.float32, -bound, bound)
        return w, b

    w1, b1 = linear(ks[0], ks[1], n_feature, n_hidden1)
    w2, b2 = linear(ks[2], ks[3], n_hidden1, n_hidden2)
    w3, b3 = linear(ks[4], ks[5], n_hidden2, n_output)
    return {"w1": w1, "b1": b1, "w2": w2, "b2": b2, "w3": w3, "b3": b3}


def nn_forward_ref(x, p):
    h1 = jax.nn.sigmoid(x @ p["w1"] + p["b1"])
    h2 = jax.nn.sigmoid(h1 @ p["w2"] + p["b2"])
    return h2 @ p["w3"] + p["b3"]


if __name__ == "__main__":
    key = jax.random.PRNGKey(0)
    k_x, k_p = jax.random.split(key)

    batch = 8
    n_feature, n_hidden1, n_hidden2, n_output = 16, 32, 32, 8

    x = jax.random.normal(k_x, (batch, n_feature), jnp.float32)
    params = init_params(k_p, n_feature, n_hidden1, n_hidden2, n_output)

    prepared = prepare_params(params)                       # one-time weight prep
    fwd = jax.jit(functools.partial(nn_forward, n_output=n_output))

    out = jax.block_until_ready(fwd(x, prepared))
    assert out.shape == (batch, n_output)

    ref = nn_forward_ref(x, params)
    # bf16 matmul operands with f32 accumulation -> loosened tolerance.
    np.testing.assert_allclose(np.asarray(out), np.asarray(ref), rtol=2e-2, atol=2e-2)

    print("KERNEL_OK")
</pallas_src>

<mosaic_0001>
module attributes {stable_mosaic.version = 11 : i64} {
  func.func @mlp_kernel(%arg0: i32, %arg1: memref<16x128xbf16, #tpu.memory_space<vmem>>, %arg2: memref<128x128xbf16, #tpu.memory_space<vmem>>, %arg3: memref<128x128xbf16, #tpu.memory_space<vmem>>, %arg4: memref<128x128xbf16, #tpu.memory_space<vmem>>, %arg5: memref<1x384xf32, #tpu.memory_space<vmem>>, %arg6: memref<16x128xf32, #tpu.memory_space<vmem>>) attributes {dimension_semantics = [#tpu.dimension_semantics<parallel>], iteration_bounds = array<i64: 1>, scalar_prefetch = 0 : i64, scratch_operands = 0 : i64, tpu.core_type = #tpu.core_type<tc>, window_params = [{transform_indices = @transform_0, window_bounds = array<i64: 16, 128>}, {pipeline_mode = #tpu.pipeline_mode<synchronous>, transform_indices = @transform_1, window_bounds = array<i64: 128, 128>}, {pipeline_mode = #tpu.pipeline_mode<synchronous>, transform_indices = @transform_2, window_bounds = array<i64: 128, 128>}, {pipeline_mode = #tpu.pipeline_mode<synchronous>, transform_indices = @transform_3, window_bounds = array<i64: 128, 128>}, {pipeline_mode = #tpu.pipeline_mode<synchronous>, transform_indices = @transform_4, window_bounds = array<i64: 1, 384>}, {transform_indices = @transform_5, window_bounds = array<i64: 16, 128>}]} {
    %c0 = arith.constant 0 : index
    %c0_0 = arith.constant 0 : index
    %0 = vector.load %arg1[%c0, %c0_0] : memref<16x128xbf16, #tpu.memory_space<vmem>>, vector<16x128xbf16>
    %c0_1 = arith.constant 0 : index
    %c0_2 = arith.constant 0 : index
    %1 = vector.load %arg5[%c0_1, %c0_2] : memref<1x384xf32, #tpu.memory_space<vmem>>, vector<1x128xf32>
    %c0_3 = arith.constant 0 : index
    %c128 = arith.constant 128 : index
    %2 = vector.load %arg5[%c0_3, %c128] : memref<1x384xf32, #tpu.memory_space<vmem>>, vector<1x128xf32>
    %c0_4 = arith.constant 0 : index
    %c256 = arith.constant 256 : index
    %3 = vector.load %arg5[%c0_4, %c256] : memref<1x384xf32, #tpu.memory_space<vmem>>, vector<1x128xf32>
    %c0_5 = arith.constant 0 : index
    %c0_6 = arith.constant 0 : index
    %4 = vector.load %arg2[%c0_5, %c0_6] : memref<128x128xbf16, #tpu.memory_space<vmem>>, vector<128x128xbf16>
    %cst = arith.constant dense<0.000000e+00> : vector<16x128xf32>
    %5 = tpu.matmul %0, %4, %cst {dimension_numbers = #tpu.dot_dimension_numbers<[1], [0], [0], [1], [0, 0, 1, 1], [], []>} : vector<16x128xbf16>, vector<128x128xbf16>, vector<16x128xf32> -> vector<16x128xf32>
    %6 = vector.broadcast %1 : vector<1x128xf32> to vector<16x128xf32>
    %7 = arith.addf %5, %6 : vector<16x128xf32>
    %cst_7 = arith.constant 5.000000e-01 : f32
    %8 = vector.broadcast %cst_7 : f32 to vector<16x128xf32>
    %9 = arith.mulf %8, %7 : vector<16x128xf32>
    %10 = math.tanh %9 : vector<16x128xf32>
    %cst_8 = arith.constant 5.000000e-01 : f32
    %11 = vector.broadcast %cst_8 : f32 to vector<16x128xf32>
    %12 = arith.mulf %11, %10 : vector<16x128xf32>
    %cst_9 = arith.constant 5.000000e-01 : f32
    %13 = vector.broadcast %cst_9 : f32 to vector<16x128xf32>
    %14 = arith.addf %12, %13 : vector<16x128xf32>
    %15 = arith.truncf %14 : vector<16x128xf32> to vector<16x128xbf16>
    %c0_10 = arith.constant 0 : index
    %c0_11 = arith.constant 0 : index
    %16 = vector.load %arg3[%c0_10, %c0_11] : memref<128x128xbf16, #tpu.memory_space<vmem>>, vector<128x128xbf16>
    %cst_12 = arith.constant dense<0.000000e+00> : vector<16x128xf32>
    %17 = tpu.matmul %15, %16, %cst_12 {dimension_numbers = #tpu.dot_dimension_numbers<[1], [0], [0], [1], [0, 0, 1, 1], [], []>} : vector<16x128xbf16>, vector<128x128xbf16>, vector<16x128xf32> -> vector<16x128xf32>
    %18 = vector.broadcast %2 : vector<1x128xf32> to vector<16x128xf32>
    %19 = arith.addf %17, %18 : vector<16x128xf32>
    %cst_13 = arith.constant 5.000000e-01 : f32
    %20 = vector.broadcast %cst_13 : f32 to vector<16x128xf32>
    %21 = arith.mulf %20, %19 : vector<16x128xf32>
    %22 = math.tanh %21 : vector<16x128xf32>
    %cst_14 = arith.constant 5.000000e-01 : f32
    %23 = vector.broadcast %cst_14 : f32 to vector<16x128xf32>
    %24 = arith.mulf %23, %22 : vector<16x128xf32>
    %cst_15 = arith.constant 5.000000e-01 : f32
    %25 = vector.broadcast %cst_15 : f32 to vector<16x128xf32>
    %26 = arith.addf %24, %25 : vector<16x128xf32>
    %27 = arith.truncf %26 : vector<16x128xf32> to vector<16x128xbf16>
    %c0_16 = arith.constant 0 : index
    %c0_17 = arith.constant 0 : index
    %28 = vector.load %arg4[%c0_16, %c0_17] : memref<128x128xbf16, #tpu.memory_space<vmem>>, vector<128x128xbf16>
    %cst_18 = arith.constant dense<0.000000e+00> : vector<16x128xf32>
    %29 = tpu.matmul %27, %28, %cst_18 {dimension_numbers = #tpu.dot_dimension_numbers<[1], [0], [0], [1], [0, 0, 1, 1], [], []>} : vector<16x128xbf16>, vector<128x128xbf16>, vector<16x128xf32> -> vector<16x128xf32>
    %30 = vector.broadcast %3 : vector<1x128xf32> to vector<16x128xf32>
    %31 = arith.addf %29, %30 : vector<16x128xf32>
    %c0_19 = arith.constant 0 : index
    %c0_20 = arith.constant 0 : index
    %32 = vector.load %arg6[%c0_19, %c0_20] : memref<16x128xf32, #tpu.memory_space<vmem>>, vector<16x128xf32>
    tpu.vector_store %arg6[%c0_19, %c0_20], %31 {strides = array<i32>} : memref<16x128xf32, #tpu.memory_space<vmem>>, vector<16x128xf32>,
    return
  }
  func.func @transform_0(%arg0: i32) -> (i32, i32) {
    %c0_i32 = arith.constant 0 : i32
    %c0_i32_0 = arith.constant 0 : i32
    return %arg0, %c0_i32 : i32, i32
  }
  func.func @transform_1(%arg0: i32) -> (i32, i32) {
    %c0_i32 = arith.constant 0 : i32
    %c0_i32_0 = arith.constant 0 : i32
    %c0_i32_1 = arith.constant 0 : i32
    return %c0_i32, %c0_i32_0 : i32, i32
  }
  func.func @transform_2(%arg0: i32) -> (i32, i32) {
    %c0_i32 = arith.constant 0 : i32
    %c0_i32_0 = arith.constant 0 : i32
    %c0_i32_1 = arith.constant 0 : i32
    return %c0_i32, %c0_i32_0 : i32, i32
  }
  func.func @transform_3(%arg0: i32) -> (i32, i32) {
    %c0_i32 = arith.constant 0 : i32
    %c0_i32_0 = arith.constant 0 : i32
    %c0_i32_1 = arith.constant 0 : i32
    return %c0_i32, %c0_i32_0 : i32, i32
  }
  func.func @transform_4(%arg0: i32) -> (i32, i32) {
    %c0_i32 = arith.constant 0 : i32
    %c0_i32_0 = arith.constant 0 : i32
    %c0_i32_1 = arith.constant 0 : i32
    return %c0_i32, %c0_i32_0 : i32, i32
  }
  func.func @transform_5(%arg0: i32) -> (i32, i32) {
    %c0_i32 = arith.constant 0 : i32
    %c0_i32_0 = arith.constant 0 : i32
    return %arg0, %c0_i32 : i32, i32
  }
}

</mosaic_0001>

<bundles_post_ra>
// kernel: nn_forward.1
= control target key start
LH: loop header
LB: loop body
LE: loop exit
PB: predicated region body
PF: predicated region fallthrough
CT: control target
= control target key end

     0   :  { %10 = vsyncpa [#allocation3], 0  ;;  %s745_s0 = inlined_call_operand.vmem [shape: bf16[16,128], index: 0, kind: input, shape index: {}]   ;;  %s746_s1 = inlined_call_operand.hbm [shape: bf16[128,128], index: 1, kind: input, shape index: {}]   ;;  %s747_s2 = inlined_call_operand.hbm [shape: bf16[128,128], index: 2, kind: input, shape index: {}]   ;;  %s748_s3 = inlined_call_operand.hbm [shape: bf16[128,128], index: 3, kind: input, shape index: {}]   ;;  %s749_s4 = inlined_call_operand.vmem [shape: f32[1,384], index: 4, kind: input, shape index: {}]   ;;  %s750_s5 = inlined_call_operand.vmem [shape: f32[16,128], index: 5, kind: output, shape index: {}]  }
   0x1   :  { %11 = vsyncpa [#allocation5], 0  ;;  %s651_s18 = smov [#allocation4]   ;;  %s652_s20 = smov [#allocation2]  }
   0x2   :  { %s31_s19 = sshll.u32 %s651_s18, 4  ;;  %s19_s21 = sshll.u32 %s652_s20, 4  ;;  %s32_s19 = int_to_ptr.vmem [resolvable:$true] %s31_s19  ;;  %s20_s21 = int_to_ptr.vmem [resolvable:$true] %s19_s21 }
   0x3   :  { %s595_s22 = scalar_lea.vmem %s32_s19, 1024  ;;  %p600_p1 = scmp.lt.s32.totalorder %s32_s19, %s32_s19 }
   0x4   :  { %p596_p0 = scmp.ne.s32.totalorder %s32_s19, %s595_s22  ;;  %p601_p2 = scmp.lt.s32.totalorder %s595_s22, %s595_s22 }
   0x6   :  { %p602_p3 = por %p601_p2, %p600_p1 }
   0x8   :  { %p603_p4 = pnand %p602_p3, %p596_p0 }
   0xa   :  { %606 = shalt.err (!%p603_p4)
}
   0xb   :  { %s653_s23 = smov 64   ;;  %s654_s24 = smov 4  }
   0xc   :  { %37 = dma.hbm_to_vmem [thread:$0]  %s747_s2, 1024, %s32_s19, [#allocation5], %s653_s23, %s653_s23, %s654_s24  }
   0xd   :  { %s615_s27 = scalar_lea.vmem %s20_s21, 1024  ;;  %p620_p6 = scmp.lt.s32.totalorder %s20_s21, %s20_s21 }
   0xe   :  { %p616_p5 = scmp.ne.s32.totalorder %s20_s21, %s615_s27  ;;  %p621_p7 = scmp.lt.s32.totalorder %s615_s27, %s615_s27 }
  0x10   :  { %p622_p8 = por %p621_p7, %p620_p6 }
  0x12   :  { %p623_p9 = pnand %p622_p8, %p616_p5 }
  0x14   :  { %626 = shalt.err (!%p623_p9)
}
  0x15   :  { %25 = dma.hbm_to_vmem [thread:$0]  %s746_s1, 1024, %s20_s21, [#allocation3], %s653_s23, %s653_s23, %s654_s24  }
  0x16   :  { %s655_s30 = smov [#allocation6]  }
  0x17   :  { %s43_s6 = sshll.u32 %s655_s30, 4  ;;  %s44_s6 = int_to_ptr.vmem [resolvable:$true] %s43_s6 }
  0x18   :  { %s635_s7 = scalar_lea.vmem %s44_s6, 1024  ;;  %p640_p11 = scmp.lt.s32.totalorder %s44_s6, %s44_s6 }
  0x19   :  { %p636_p10 = scmp.ne.s32.totalorder %s44_s6, %s635_s7  ;;  %p641_p12 = scmp.lt.s32.totalorder %s635_s7, %s635_s7 }
  0x1b   :  { %p642_p13 = por %p641_p12, %p640_p11 }
  0x1d   :  { %p643_p0 = pnand %p642_p13, %p636_p10 }
  0x1f   :  { %646 = shalt.err (!%p643_p0)
}
  0x20   :  { %49 = dma.hbm_to_vmem [thread:$0]  %s748_s3, 1024, %s44_s6, [#allocation5], %s653_s23, %s653_s23, %s654_s24  }
  0x21   :  { %647 = dma.done.wait [#allocation3], 1024  }
  0x22   :  { %648 = vsyncadd [#allocation3], 4294966272 }
  0x23   :  { %649 = dma.done.wait [#allocation5], 2048  }
  0x24   :  { %650 = vsyncadd [#allocation5], 4294965248  ;;  %v656_v0 = vmov 0.0   ;;  %vm657_vm0 = vmmov 0   ;;  %v554_v1 = vld [vmem:[#allocation2 + $0x38] sm:$0xff]   ;;  %v555_v2 = vld [vmem:[#allocation2 + $0x30] sm:$0xff]  }
  0x25   :  { %487 = vmatprep.subr.bf16.mxu0 %v656_v0  ;;  %503 = vmatprep.mubr.msk.bf16.mxu0 %vm657_vm0, %v656_v0  ;;  %v556_v3 = vld [vmem:[#allocation2 + $0x28] sm:$0xff]   ;;  %v563_v4 = vld [vmem:[#allocation4 + $0x38] sm:$0xff]   ;;  %v557_v5 = vld [vmem:[#allocation2 + $0x20] sm:$0xff]  }
  0x26   :  { %507 = vmatprep.subr.bf16.mxu1 %v656_v0  ;;  %523 = vmatprep.mubr.msk.bf16.mxu1 %vm657_vm0, %v656_v0  ;;  %v558_v6 = vld [vmem:[#allocation2 + $0x18] sm:$0xff]   ;;  %v559_v7 = vld [vmem:[#allocation2 + $0x10] sm:$0xff]   ;;  %v560_v8 = vld [vmem:[#allocation2 + $0x8] sm:$0xff]  }
  0x27   :  { %488 = vmatpush3.bf16.msra.mxu0 %v554_v1  ;;  %508 = vmatpush3.bf16.msra.mxu1 %v563_v4  ;;  %v561_v9 = vld [vmem:[#allocation2] sm:$0xff]   ;;  %v564_v11 = vld [vmem:[#allocation4 + $0x30] sm:$0xff]   ;;  %v565_v12 = vld [vmem:[#allocation4 + $0x28] sm:$0xff]  }
  0x28   :  { %489 = vmatprep.subr.bf16.mxu0 %v656_v0  ;;  %509 = vmatprep.subr.bf16.mxu1 %v656_v0  ;;  %v562_v10 = vld [vmem:[%s745_s0] sm:$0xff]   ;;  %v567_v14 = vld [vmem:[#allocation4 + $0x18] sm:$0xff]   ;;  %v568_v15 = vld [vmem:[#allocation4 + $0x10] sm:$0xff]  }
  0x29   :  { %v566_v13 = vld [vmem:[#allocation4 + $0x20] sm:$0xff]   ;;  %v569_v16 = vld [vmem:[#allocation4 + $0x8] sm:$0xff]   ;;  %v571_v18 = vld [vmem:[#allocation6 + $0x38] sm:$0xff]  }
  0x2a   :  { %v570_v17 = vld [vmem:[#allocation4] sm:$0xff]   ;;  %v572_v35 = vld [vmem:[#allocation6 + $0x30] sm:$0xff]   ;;  %v573_v36 = vld [vmem:[#allocation6 + $0x28] sm:$0xff]  }
  0x2b   :  { %490 = vmatpush3.bf16.msra.mxu0 %v555_v2  ;;  %510 = vmatpush3.bf16.msra.mxu1 %v564_v11  ;;  %v432_v19 = vld [vmem:[%s749_s4] ss:$0 sm:$0xff]  ;;  %v575_v38 = vld [vmem:[#allocation6 + $0x18] sm:$0xff]   ;;  %v576_v39 = vld [vmem:[#allocation6 + $0x10] sm:$0xff]  }
  0x2c   :  { %491 = vmatprep.subr.bf16.mxu0 %v656_v0  ;;  %511 = vmatprep.subr.bf16.mxu1 %v656_v0  ;;  %v574_v37 = vld [vmem:[#allocation6 + $0x20] sm:$0xff]   ;;  %v577_v40 = vld [vmem:[#allocation6 + $0x8] sm:$0xff]  }
  0x2d   :  { %v578_v41 = vld [vmem:[#allocation6] sm:$0xff]  }
  0x2e   :  { %v442_v42 = vld [vmem:[%s749_s4 + $0x1] ss:$0 sm:$0xff]  ;;  %v451_v58 = vld [vmem:[%s749_s4 + $0x2] ss:$0 sm:$0xff] }
  0x2f   :  { %492 = vmatpush3.bf16.msra.mxu0 %v556_v3  ;;  %512 = vmatpush3.bf16.msra.mxu1 %v565_v12 }
  0x30   :  { %493 = vmatprep.subr.bf16.mxu0 %v656_v0  ;;  %513 = vmatprep.subr.bf16.mxu1 %v656_v0 }
  0x33   :  { %494 = vmatpush3.bf16.msra.mxu0 %v557_v5  ;;  %514 = vmatpush3.bf16.msra.mxu1 %v566_v13 }
  0x34   :  { %495 = vmatprep.subr.bf16.mxu0 %v656_v0  ;;  %515 = vmatprep.subr.bf16.mxu1 %v656_v0 }
  0x37   :  { %496 = vmatpush3.bf16.msra.mxu0 %v558_v6  ;;  %516 = vmatpush3.bf16.msra.mxu1 %v567_v14 }
  0x38   :  { %497 = vmatprep.subr.bf16.mxu0 %v656_v0  ;;  %517 = vmatprep.subr.bf16.mxu1 %v656_v0 }
  0x3b   :  { %498 = vmatpush3.bf16.msra.mxu0 %v559_v7  ;;  %518 = vmatpush3.bf16.msra.mxu1 %v568_v15 }
  0x3c   :  { %499 = vmatprep.subr.bf16.mxu0 %v656_v0  ;;  %519 = vmatprep.subr.bf16.mxu1 %v656_v0 }
  0x3f   :  { %500 = vmatpush3.bf16.msra.mxu0 %v560_v8  ;;  %520 = vmatpush3.bf16.msra.mxu1 %v569_v16 }
  0x40   :  { %501 = vmatprep.subr.bf16.mxu0 %v656_v0  ;;  %521 = vmatprep.subr.bf16.mxu1 %v656_v0 }
  0x43   :  { %502 = vmatpush3.bf16.msra.mxu0 %v561_v9  ;;  %522 = vmatpush3.bf16.msra.mxu1 %v570_v17 }
  0x44   :  { %527 = vmatprep.subr.bf16.mxu0 %v656_v0 }
  0x46   :  { %504 = vmatmul.mubr.bf16.vlgmr.msra.gmra.mxu0 %v562_v10 }
  0x47   :  { %543 = vmatprep.mubr.msk.bf16.mxu0 %vm657_vm0, %v656_v0  ;;  %528 = vmatpush3.bf16.msra.mxu0 %v571_v18 }
  0x48   :  { %529 = vmatprep.subr.bf16.mxu0 %v656_v0 }
  0x4b   :  { %530 = vmatpush3.bf16.msra.mxu0 %v572_v35 }
  0x4c   :  { %531 = vmatprep.subr.bf16.mxu0 %v656_v0 }
  0x4f   :  { %532 = vmatpush3.bf16.msra.mxu0 %v573_v36 }
  0x50   :  { %533 = vmatprep.subr.bf16.mxu0 %v656_v0 }
  0x53   :  { %534 = vmatpush3.bf16.msra.mxu0 %v574_v37 }
  0x54   :  { %535 = vmatprep.subr.bf16.mxu0 %v656_v0 }
  0x57   :  { %536 = vmatpush3.bf16.msra.mxu0 %v575_v38 }
  0x58   :  { %537 = vmatprep.subr.bf16.mxu0 %v656_v0 }
  0x5b   :  { %538 = vmatpush3.bf16.msra.mxu0 %v576_v39 }
  0x5c   :  { %539 = vmatprep.subr.bf16.mxu0 %v656_v0 }
  0x5f   :  { %540 = vmatpush3.bf16.msra.mxu0 %v577_v40 }
  0x60   :  { %541 = vmatprep.subr.bf16.mxu0 %v656_v0 }
  0x63   :  { %542 = vmatpush3.bf16.msra.mxu0 %v578_v41 }
 0x106   :  { %v177_v20 = vpop.f32.mrf.mxu0 }
 0x107   :  { %v178_v21 = vadd.f32 %v432_v19, %v177_v20 }
 0x108   :  { %v505_v22 = vpop.f32.mrf.mxu0 }
 0x109   :  { %v184_v23 = vmul.f32 0.5, %v178_v21 }
 0x10a   :  { %v180_v24 = vpop.f32.mrf.mxu0 }
 0x10b   :  { %579 = vtanh.f32 %v184_v23  ;;  %v181_v25 = vadd.f32 %v432_v19, %v180_v24 }
 0x10c   :  { %v506_v26 = vpop.f32.mrf.mxu0 }
 0x10d   :  { %v185_v27 = vmul.f32 0.5, %v181_v25 }
 0x10f   :  { %581 = vtanh.f32 %v185_v27 }
 0x118   :  { %v580_v28 = vpop.eup %579 }
 0x119   :  { %v188_v29 = vmul.f32 0.5, %v580_v28 }
 0x11b   :  { %v190_v32 = vadd.f32 0.5, %v188_v29 }
 0x11c   :  { %v582_v30 = vpop.eup %581 }
 0x11d   :  { %v189_v31 = vmul.f32 0.5, %v582_v30 }
 0x11f   :  { %v191_v33 = vadd.f32 0.5, %v189_v31 }
 0x121   :  { %v192_v34 = vpack.c.bf16 %v191_v33, %v190_v32 }
 0x123   :  { %524 = vmatmul.mubr.bf16.vlgmr.msra.gmra.mxu1 %v192_v34 }
 0x1e3   :  { %v297_v43 = vpop.f32.mrf.mxu1 }
 0x1e4   :  { %v298_v44 = vadd.f32 %v442_v42, %v297_v43 }
 0x1e5   :  { %v525_v45 = vpop.f32.mrf.mxu1 }
 0x1e6   :  { %v304_v46 = vmul.f32 0.5, %v298_v44 }
 0x1e7   :  { %v300_v47 = vpop.f32.mrf.mxu1 }
 0x1e8   :  { %583 = vtanh.f32 %v304_v46  ;;  %v301_v48 = vadd.f32 %v442_v42, %v300_v47 }
 0x1e9   :  { %v526_v49 = vpop.f32.mrf.mxu1 }
 0x1ea   :  { %v305_v50 = vmul.f32 0.5, %v301_v48 }
 0x1ec   :  { %585 = vtanh.f32 %v305_v50 }
 0x1f5   :  { %v584_v51 = vpop.eup %583 }
 0x1f6   :  { %v308_v52 = vmul.f32 0.5, %v584_v51 }
 0x1f8   :  { %v310_v55 = vadd.f32 0.5, %v308_v52 }
 0x1f9   :  { %v586_v53 = vpop.eup %585 }
 0x1fa   :  { %v309_v54 = vmul.f32 0.5, %v586_v53 }
 0x1fc   :  { %v311_v56 = vadd.f32 0.5, %v309_v54 }
 0x1fe   :  { %v312_v57 = vpack.c.bf16 %v311_v56, %v310_v55 }
 0x200   :  { %544 = vmatmul.mubr.bf16.vlgmr.msra.gmra.mxu0 %v312_v57 }
 0x2c0   :  { %v417_v59 = vpop.f32.mrf.mxu0 }
 0x2c1   :  { %v418_v60 = vadd.f32 %v451_v58, %v417_v59 }
 0x2c2   :  { %v545_v61 = vpop.f32.mrf.mxu0 }
 0x2c3   :  { %424 = vst [vmem:[%s750_s5] sm:$0xff] %v418_v60 }
 0x2c4   :  { %v420_v62 = vpop.f32.mrf.mxu0 }
 0x2c5   :  { %v421_v63 = vadd.f32 %v451_v58, %v420_v62 }
 0x2c6   :  { %v546_v0 = vpop.f32.mrf.mxu0 }
 0x2c7   :  { %425 = vst [vmem:[%s750_s5 + $0x8] sm:$0xff] %v421_v63 }
 0x2c8   :  { %430 = vsyncpa [#allocation3], 1 }
 0x2c9   :  { %431 = vsyncpa [#allocation5], 1 }

</bundles_post_ra>
